<compile_context>
chip_gen: v5e
topology: v5e:2x2
jax: 0.10.0
libtpu: 0.0.40
codegen_flags: <defaults>
</compile_context>

<pallas_src>
import functools

import jax
import jax.numpy as jnp
from jax.experimental import pallas as pl
from jax.experimental.pallas import tpu as pltpu


def _bucket_stats_kernel(thr_ref, x_ref, out_ref, *, n_bins):
    """One grid point = one (TB, TN) tile of x; no state shared across grid points.

    thr_ref : SMEM (n_bins,) f32      -- un-normalized bucket thresholds t_e
    x_ref   : VMEM (TB, TN)           -- input tile
    out_ref : VMEM (TB, 2*n_bins+1) f32 partial stats for this (b, k) tile:
              lane 0              : sum(x) over the tile               (S_{-1})
              lanes 1..n_bins     : sum(x * (x > t_e)), e = 0..n_bins-1 (S_e)
              lanes n_bins+1..2n  : count(x > t_e),     e = 0..n_bins-1 (C_e)
    """
    x = x_ref[...].astype(jnp.float32)                       # (TB, TN), f32 compute

    # Row totals == the "gt_{-1} = all ones" boundary.
    out_ref[:, 0:1] = jnp.sum(x, axis=1, keepdims=True)

    # Sorted edges => (x > t_e) monotone in e; bucket i stats are differences of
    # these, recovered in the wrapper.  Static Python loop: 10 compares + 20 row
    # reductions, each (TB, 1) result stored immediately (no long live ranges).
    for e in range(n_bins):
        m = x > thr_ref[e]
        out_ref[:, 1 + e:2 + e] = jnp.sum(
            jnp.where(m, x, 0.0), axis=1, keepdims=True)
        out_ref[:, 1 + n_bins + e:2 + n_bins + e] = jnp.sum(
            m.astype(jnp.float32), axis=1, keepdims=True)


def _pick_block(dim, cap, align):
    """Largest multiple of `align` that divides `dim` and is <= cap; falls back to
    the full dimension (single block, always legal) if no such divisor exists."""
    if dim <= cap:
        return dim
    t = (cap // align) * align
    while t >= align:
        if dim % t == 0:
            return t
        t -= align
    return dim


def bucket_fusion(x, bin_edges, n_bins=10, *, block_b=None, block_n=None):
    """x: (B, N) f32/bf16; bin_edges: (n_bins+1,) sorted f32  ->  (B, 1) x.dtype."""
    B, N = x.shape
    W = 2 * n_bins + 1

    # ---- Phase 1 (wrapper): global min/max + folded thresholds -----------------
    # One XLA reduce pass; keeps the Pallas kernel a single stream over x.
    xf32_min_max_src = x.astype(jnp.float32)
    x_min = jnp.min(xf32_min_max_src)
    x_max = jnp.max(xf32_min_max_src)
    rng = x_max - x_min + 1e-6
    # bucketize(x_norm, edges) counts edges < x_norm  <=>  x > x_min + edge * rng.
    # Buckets 0..n_bins-1 only need edges 0..n_bins-1 (values past edge n_bins-1
    # land in bucket >= n_bins and are dropped, exactly as in the PyTorch module).
    thresholds = (x_min + bin_edges.astype(jnp.float32) * rng)[:n_bins]

    # ---- Tile selection ---------------------------------------------------------
    itemsize = jnp.dtype(x.dtype).itemsize
    if block_n is None:
        block_n = _pick_block(N, 2048, 128)
    if block_b is None:
        # Keep a tile around <= ~2 MiB so double-buffering sits well inside VMEM
        # on every generation (v5e/v6e 128 MiB, v7x 64 MiB).
        cap_rows = min(256, max(8, (2 * 2**20) // max(1, block_n * itemsize)))
        block_b = _pick_block(B, cap_rows, 8)
    if N % block_n or (block_n != N and block_n % 128):
        raise ValueError(f"bad block_n={block_n} for N={N}")
    if B % block_b or (block_b != B and block_b % 8):
        raise ValueError(f"bad block_b={block_b} for B={B}")
    grid = (B // block_b, N // block_n)
    K = grid[1]

    tile_bytes = block_b * block_n * itemsize
    vmem_limit = int(min(64 * 2**20, max(16 * 2**20, 4 * tile_bytes + (2 << 20))))

    kernel = functools.partial(_bucket_stats_kernel, n_bins=n_bins)

    # Partial stats per (b, k) tile; every grid point writes a distinct block, so
    # there is no accumulator/ordering dependence and both axes are "parallel".
    raw = pl.pallas_call(
        kernel,
        out_shape=jax.ShapeDtypeStruct((K, B, W), jnp.float32),
        grid_spec=pltpu.PrefetchScalarGridSpec(
            num_scalar_prefetch=0,
            grid=grid,
            in_specs=[
                pl.BlockSpec(memory_space=pltpu.MemorySpace.SMEM),       # thresholds
                pl.BlockSpec((block_b, block_n), lambda b, k: (b, k)),   # x tile
            ],
            out_specs=pl.BlockSpec((None, block_b, W), lambda b, k: (k, b, 0)),
        ),
        compiler_params=pltpu.CompilerParams(
            dimension_semantics=("parallel", "parallel"),
            vmem_limit_bytes=vmem_limit),
    )(thresholds, x)

    # ---- Phase 3 (wrapper epilogue, O(B*n_bins) work) ---------------------------
    agg = jnp.sum(raw, axis=0)                            # (B, W): reduce over k tiles
    s_all = agg[:, :n_bins + 1]                           # [S_{-1}, S_0, ..., S_{nb-1}]
    c = agg[:, n_bins + 1:]                               # [C_0, ..., C_{nb-1}]
    c_all = jnp.concatenate(
        [jnp.full((B, 1), jnp.float32(N), jnp.float32), c], axis=1)  # C_{-1} = N exact
    bucket_sum = s_all[:, :-1] - s_all[:, 1:]             # sum(x)  where bin == i
    bucket_cnt = c_all[:, :-1] - c_all[:, 1:]             # count   where bin == i
    fused = jnp.mean(bucket_sum / (bucket_cnt + 1e-6), axis=1, keepdims=True)
    return fused.astype(x.dtype)


def bucket_fusion_ref(x, bin_edges, n_bins=10):
    """Dense pure-JAX reference of BucketFusion.forward (no Pallas).

    Bucket boundaries are expressed in un-normalized space (x > x_min + edge*rng),
    which equals torch.bucketize((x - min)/rng, edges) for sorted edges up to fp
    rounding at the boundaries; the rest (bucketize-count, per-bucket masked means,
    mean over buckets) mirrors the PyTorch module literally.
    """
    xf = x.astype(jnp.float32)
    x_min = jnp.min(xf)
    x_max = jnp.max(xf)
    rng = x_max - x_min + 1e-6
    thr = x_min + bin_edges.astype(jnp.float32) * rng            # (n_bins+1,)
    bin_idx = jnp.sum((xf[:, :, None] > thr[None, None, :]).astype(jnp.int32), axis=-1)
    means = []
    for i in range(n_bins):
        mask = bin_idx == i
        s = jnp.sum(jnp.where(mask, xf, 0.0), axis=1)
        c = jnp.sum(mask.astype(jnp.float32), axis=1)
        means.append(s / (c + 1e-6))
    fused = jnp.stack(means, axis=1).mean(axis=1)
    return fused[:, None].astype(x.dtype)


if __name__ == "__main__":
    n_bins = 10
    # nn.Parameter(torch.linspace(0, 1, n_bins + 1)) at init.
    bin_edges = jnp.linspace(0.0, 1.0, n_bins + 1, dtype=jnp.float32)

    key = jax.random.PRNGKey(0)
    B, N = 16, 1024                      # small, but large enough to tile
    x = jax.random.normal(key, (B, N), dtype=jnp.float32)

    # Multi-tile path: grid (2, 4) -- exercises several blocks along both axes.
    out = bucket_fusion(x, bin_edges, n_bins=n_bins, block_b=8, block_n=256)
    out = jax.block_until_ready(out)
    ref = bucket_fusion_ref(x, bin_edges, n_bins=n_bins)
    assert out.shape == (B, 1), out.shape
    assert jnp.allclose(out, ref, atol=1e-4, rtol=1e-4), (out, ref)

    # Single-block path via the default tile heuristics.
    x_small = x[:8, :256]
    out_s = jax.block_until_ready(bucket_fusion(x_small, bin_edges, n_bins=n_bins))
    ref_s = bucket_fusion_ref(x_small, bin_edges, n_bins=n_bins)
    assert out_s.shape == (8, 1), out_s.shape
    assert jnp.allclose(out_s, ref_s, atol=1e-4, rtol=1e-4), (out_s, ref_s)

    # bf16 input (half HBM bytes, f32 accumulation), default tiles.
    x_bf16 = x.astype(jnp.bfloat16)
    out_b = jax.block_until_ready(bucket_fusion(x_bf16, bin_edges, n_bins=n_bins))
    ref_b = bucket_fusion_ref(x_bf16, bin_edges, n_bins=n_bins)
    assert out_b.shape == (B, 1), out_b.shape
    assert jnp.allclose(out_b.astype(jnp.float32), ref_b.astype(jnp.float32),
                        atol=1e-2, rtol=1e-2), (out_b, ref_b)

    print("KERNEL_OK")
</pallas_src>

<mosaic_0001>
module attributes {stable_mosaic.version = 11 : i64} {
  func.func @_bucket_stats_kernel(%arg0: i32, %arg1: i32, %arg2: memref<10xf32, #tpu.memory_space<smem>>, %arg3: memref<8x256xf32, #tpu.memory_space<vmem>>, %arg4: memref<1x8x21xf32, #tpu.memory_space<vmem>>) attributes {dimension_semantics = [#tpu.dimension_semantics<parallel>, #tpu.dimension_semantics<parallel>], iteration_bounds = array<i64: 2, 4>, scalar_prefetch = 0 : i64, scratch_operands = 0 : i64, tpu.core_type = #tpu.core_type<tc>, window_params = [{transform_indices = @transform_0, window_bounds = array<i64: 10>}, {transform_indices = @transform_1, window_bounds = array<i64: 8, 256>}, {transform_indices = @transform_2, window_bounds = array<i64: 1, 8, 21>}]} {
    %c0 = arith.constant 0 : index
    %c0_0 = arith.constant 0 : index
    %0 = vector.load %arg3[%c0, %c0_0] : memref<8x256xf32, #tpu.memory_space<vmem>>, vector<8x256xf32>
    %cst = arith.constant dense<0.000000e+00> : vector<8xf32>
    %1 = vector.multi_reduction <add>, %0, %cst [1] : vector<8x256xf32> to vector<8xf32>
    %2 = vector.shape_cast %1 : vector<8xf32> to vector<8x1xf32>
    %c0_1 = arith.constant 0 : index
    %c0_2 = arith.constant 0 : index
    %c0_3 = arith.constant 0 : index
    %3 = vector.load %arg4[%c0_1, %c0_2, %c0_3] : memref<1x8x21xf32, #tpu.memory_space<vmem>>, vector<1x8x1xf32>
    %4 = vector.shape_cast %3 : vector<1x8x1xf32> to vector<8x1xf32>
    %5 = vector.shape_cast %2 : vector<8x1xf32> to vector<1x8x1xf32>
    tpu.vector_store %arg4[%c0_1, %c0_2, %c0_3], %5 {strides = array<i32>} : memref<1x8x21xf32, #tpu.memory_space<vmem>>, vector<1x8x1xf32>,
    %c0_4 = arith.constant 0 : index
    %6 = memref.load %arg2[%c0_4] : memref<10xf32, #tpu.memory_space<smem>>
    %7 = vector.broadcast %6 : f32 to vector<8x256xf32>
    %8 = arith.cmpf ogt, %0, %7 : vector<8x256xf32>
    %cst_5 = arith.constant 0.000000e+00 : f32
    %9 = vector.broadcast %cst_5 : f32 to vector<8x256xf32>
    %10 = arith.select %8, %0, %9 : vector<8x256xi1>, vector<8x256xf32>
    %cst_6 = arith.constant dense<0.000000e+00> : vector<8xf32>
    %11 = vector.multi_reduction <add>, %10, %cst_6 [1] : vector<8x256xf32> to vector<8xf32>
    %12 = vector.shape_cast %11 : vector<8xf32> to vector<8x1xf32>
    %c0_7 = arith.constant 0 : index
    %c0_8 = arith.constant 0 : index
    %c1 = arith.constant 1 : index
    %13 = vector.load %arg4[%c0_7, %c0_8, %c1] : memref<1x8x21xf32, #tpu.memory_space<vmem>>, vector<1x8x1xf32>
    %14 = vector.shape_cast %13 : vector<1x8x1xf32> to vector<8x1xf32>
    %15 = vector.shape_cast %12 : vector<8x1xf32> to vector<1x8x1xf32>
    tpu.vector_store %arg4[%c0_7, %c0_8, %c1], %15 {strides = array<i32>} : memref<1x8x21xf32, #tpu.memory_space<vmem>>, vector<1x8x1xf32>,
    %16 = arith.extui %8 : vector<8x256xi1> to vector<8x256xi32>
    %17 = arith.sitofp %16 : vector<8x256xi32> to vector<8x256xf32>
    %cst_9 = arith.constant dense<0.000000e+00> : vector<8xf32>
    %18 = vector.multi_reduction <add>, %17, %cst_9 [1] : vector<8x256xf32> to vector<8xf32>
    %19 = vector.shape_cast %18 : vector<8xf32> to vector<8x1xf32>
    %c0_10 = arith.constant 0 : index
    %c0_11 = arith.constant 0 : index
    %c11 = arith.constant 11 : index
    %20 = vector.load %arg4[%c0_10, %c0_11, %c11] : memref<1x8x21xf32, #tpu.memory_space<vmem>>, vector<1x8x1xf32>
    %21 = vector.shape_cast %20 : vector<1x8x1xf32> to vector<8x1xf32>
    %22 = vector.shape_cast %19 : vector<8x1xf32> to vector<1x8x1xf32>
    tpu.vector_store %arg4[%c0_10, %c0_11, %c11], %22 {strides = array<i32>} : memref<1x8x21xf32, #tpu.memory_space<vmem>>, vector<1x8x1xf32>,
    %c1_12 = arith.constant 1 : index
    %23 = memref.load %arg2[%c1_12] : memref<10xf32, #tpu.memory_space<smem>>
    %24 = vector.broadcast %23 : f32 to vector<8x256xf32>
    %25 = arith.cmpf ogt, %0, %24 : vector<8x256xf32>
    %cst_13 = arith.constant 0.000000e+00 : f32
    %26 = vector.broadcast %cst_13 : f32 to vector<8x256xf32>
    %27 = arith.select %25, %0, %26 : vector<8x256xi1>, vector<8x256xf32>
    %cst_14 = arith.constant dense<0.000000e+00> : vector<8xf32>
    %28 = vector.multi_reduction <add>, %27, %cst_14 [1] : vector<8x256xf32> to vector<8xf32>
    %29 = vector.shape_cast %28 : vector<8xf32> to vector<8x1xf32>
    %c0_15 = arith.constant 0 : index
    %c0_16 = arith.constant 0 : index
    %c2 = arith.constant 2 : index
    %30 = vector.load %arg4[%c0_15, %c0_16, %c2] : memref<1x8x21xf32, #tpu.memory_space<vmem>>, vector<1x8x1xf32>
    %31 = vector.shape_cast %30 : vector<1x8x1xf32> to vector<8x1xf32>
    %32 = vector.shape_cast %29 : vector<8x1xf32> to vector<1x8x1xf32>
    tpu.vector_store %arg4[%c0_15, %c0_16, %c2], %32 {strides = array<i32>} : memref<1x8x21xf32, #tpu.memory_space<vmem>>, vector<1x8x1xf32>,
    %33 = arith.extui %25 : vector<8x256xi1> to vector<8x256xi32>
    %34 = arith.sitofp %33 : vector<8x256xi32> to vector<8x256xf32>
    %cst_17 = arith.constant dense<0.000000e+00> : vector<8xf32>
    %35 = vector.multi_reduction <add>, %34, %cst_17 [1] : vector<8x256xf32> to vector<8xf32>
    %36 = vector.shape_cast %35 : vector<8xf32> to vector<8x1xf32>
    %c0_18 = arith.constant 0 : index
    %c0_19 = arith.constant 0 : index
    %c12 = arith.constant 12 : index
    %37 = vector.load %arg4[%c0_18, %c0_19, %c12] : memref<1x8x21xf32, #tpu.memory_space<vmem>>, vector<1x8x1xf32>
    %38 = vector.shape_cast %37 : vector<1x8x1xf32> to vector<8x1xf32>
    %39 = vector.shape_cast %36 : vector<8x1xf32> to vector<1x8x1xf32>
    tpu.vector_store %arg4[%c0_18, %c0_19, %c12], %39 {strides = array<i32>} : memref<1x8x21xf32, #tpu.memory_space<vmem>>, vector<1x8x1xf32>,
    %c2_20 = arith.constant 2 : index
    %40 = memref.load %arg2[%c2_20] : memref<10xf32, #tpu.memory_space<smem>>
    %41 = vector.broadcast %40 : f32 to vector<8x256xf32>
    %42 = arith.cmpf ogt, %0, %41 : vector<8x256xf32>
    %cst_21 = arith.constant 0.000000e+00 : f32
    %43 = vector.broadcast %cst_21 : f32 to vector<8x256xf32>
    %44 = arith.select %42, %0, %43 : vector<8x256xi1>, vector<8x256xf32>
    %cst_22 = arith.constant dense<0.000000e+00> : vector<8xf32>
    %45 = vector.multi_reduction <add>, %44, %cst_22 [1] : vector<8x256xf32> to vector<8xf32>
    %46 = vector.shape_cast %45 : vector<8xf32> to vector<8x1xf32>
    %c0_23 = arith.constant 0 : index
    %c0_24 = arith.constant 0 : index
    %c3 = arith.constant 3 : index
    %47 = vector.load %arg4[%c0_23, %c0_24, %c3] : memref<1x8x21xf32, #tpu.memory_space<vmem>>, vector<1x8x1xf32>
    %48 = vector.shape_cast %47 : vector<1x8x1xf32> to vector<8x1xf32>
    %49 = vector.shape_cast %46 : vector<8x1xf32> to vector<1x8x1xf32>
    tpu.vector_store %arg4[%c0_23, %c0_24, %c3], %49 {strides = array<i32>} : memref<1x8x21xf32, #tpu.memory_space<vmem>>, vector<1x8x1xf32>,
    %50 = arith.extui %42 : vector<8x256xi1> to vector<8x256xi32>
    %51 = arith.sitofp %50 : vector<8x256xi32> to vector<8x256xf32>
    %cst_25 = arith.constant dense<0.000000e+00> : vector<8xf32>
    %52 = vector.multi_reduction <add>, %51, %cst_25 [1] : vector<8x256xf32> to vector<8xf32>
    %53 = vector.shape_cast %52 : vector<8xf32> to vector<8x1xf32>
    %c0_26 = arith.constant 0 : index
    %c0_27 = arith.constant 0 : index
    %c13 = arith.constant 13 : index
    %54 = vector.load %arg4[%c0_26, %c0_27, %c13] : memref<1x8x21xf32, #tpu.memory_space<vmem>>, vector<1x8x1xf32>
    %55 = vector.shape_cast %54 : vector<1x8x1xf32> to vector<8x1xf32>
    %56 = vector.shape_cast %53 : vector<8x1xf32> to vector<1x8x1xf32>
    tpu.vector_store %arg4[%c0_26, %c0_27, %c13], %56 {strides = array<i32>} : memref<1x8x21xf32, #tpu.memory_space<vmem>>, vector<1x8x1xf32>,
    %c3_28 = arith.constant 3 : index
    %57 = memref.load %arg2[%c3_28] : memref<10xf32, #tpu.memory_space<smem>>
    %58 = vector.broadcast %57 : f32 to vector<8x256xf32>
    %59 = arith.cmpf ogt, %0, %58 : vector<8x256xf32>
    %cst_29 = arith.constant 0.000000e+00 : f32
    %60 = vector.broadcast %cst_29 : f32 to vector<8x256xf32>
    %61 = arith.select %59, %0, %60 : vector<8x256xi1>, vector<8x256xf32>
    %cst_30 = arith.constant dense<0.000000e+00> : vector<8xf32>
    %62 = vector.multi_reduction <add>, %61, %cst_30 [1] : vector<8x256xf32> to vector<8xf32>
    %63 = vector.shape_cast %62 : vector<8xf32> to vector<8x1xf32>
    %c0_31 = arith.constant 0 : index
    %c0_32 = arith.constant 0 : index
    %c4 = arith.constant 4 : index
    %64 = vector.load %arg4[%c0_31, %c0_32, %c4] : memref<1x8x21xf32, #tpu.memory_space<vmem>>, vector<1x8x1xf32>
    %65 = vector.shape_cast %64 : vector<1x8x1xf32> to vector<8x1xf32>
    %66 = vector.shape_cast %63 : vector<8x1xf32> to vector<1x8x1xf32>
    tpu.vector_store %arg4[%c0_31, %c0_32, %c4], %66 {strides = array<i32>} : memref<1x8x21xf32, #tpu.memory_space<vmem>>, vector<1x8x1xf32>,
    %67 = arith.extui %59 : vector<8x256xi1> to vector<8x256xi32>
    %68 = arith.sitofp %67 : vector<8x256xi32> to vector<8x256xf32>
    %cst_33 = arith.constant dense<0.000000e+00> : vector<8xf32>
    %69 = vector.multi_reduction <add>, %68, %cst_33 [1] : vector<8x256xf32> to vector<8xf32>
    %70 = vector.shape_cast %69 : vector<8xf32> to vector<8x1xf32>
    %c0_34 = arith.constant 0 : index
    %c0_35 = arith.constant 0 : index
    %c14 = arith.constant 14 : index
    %71 = vector.load %arg4[%c0_34, %c0_35, %c14] : memref<1x8x21xf32, #tpu.memory_space<vmem>>, vector<1x8x1xf32>
    %72 = vector.shape_cast %71 : vector<1x8x1xf32> to vector<8x1xf32>
    %73 = vector.shape_cast %70 : vector<8x1xf32> to vector<1x8x1xf32>
    tpu.vector_store %arg4[%c0_34, %c0_35, %c14], %73 {strides = array<i32>} : memref<1x8x21xf32, #tpu.memory_space<vmem>>, vector<1x8x1xf32>,
    %c4_36 = arith.constant 4 : index
    %74 = memref.load %arg2[%c4_36] : memref<10xf32, #tpu.memory_space<smem>>
    %75 = vector.broadcast %74 : f32 to vector<8x256xf32>
    %76 = arith.cmpf ogt, %0, %75 : vector<8x256xf32>
    %cst_37 = arith.constant 0.000000e+00 : f32
    %77 = vector.broadcast %cst_37 : f32 to vector<8x256xf32>
    %78 = arith.select %76, %0, %77 : vector<8x256xi1>, vector<8x256xf32>
    %cst_38 = arith.constant dense<0.000000e+00> : vector<8xf32>
    %79 = vector.multi_reduction <add>, %78, %cst_38 [1] : vector<8x256xf32> to vector<8xf32>
    %80 = vector.shape_cast %79 : vector<8xf32> to vector<8x1xf32>
    %c0_39 = arith.constant 0 : index
    %c0_40 = arith.constant 0 : index
    %c5 = arith.constant 5 : index
    %81 = vector.load %arg4[%c0_39, %c0_40, %c5] : memref<1x8x21xf32, #tpu.memory_space<vmem>>, vector<1x8x1xf32>
    %82 = vector.shape_cast %81 : vector<1x8x1xf32> to vector<8x1xf32>
    %83 = vector.shape_cast %80 : vector<8x1xf32> to vector<1x8x1xf32>
    tpu.vector_store %arg4[%c0_39, %c0_40, %c5], %83 {strides = array<i32>} : memref<1x8x21xf32, #tpu.memory_space<vmem>>, vector<1x8x1xf32>,
    %84 = arith.extui %76 : vector<8x256xi1> to vector<8x256xi32>
    %85 = arith.sitofp %84 : vector<8x256xi32> to vector<8x256xf32>
    %cst_41 = arith.constant dense<0.000000e+00> : vector<8xf32>
    %86 = vector.multi_reduction <add>, %85, %cst_41 [1] : vector<8x256xf32> to vector<8xf32>
    %87 = vector.shape_cast %86 : vector<8xf32> to vector<8x1xf32>
    %c0_42 = arith.constant 0 : index
    %c0_43 = arith.constant 0 : index
    %c15 = arith.constant 15 : index
    %88 = vector.load %arg4[%c0_42, %c0_43, %c15] : memref<1x8x21xf32, #tpu.memory_space<vmem>>, vector<1x8x1xf32>
    %89 = vector.shape_cast %88 : vector<1x8x1xf32> to vector<8x1xf32>
    %90 = vector.shape_cast %87 : vector<8x1xf32> to vector<1x8x1xf32>
    tpu.vector_store %arg4[%c0_42, %c0_43, %c15], %90 {strides = array<i32>} : memref<1x8x21xf32, #tpu.memory_space<vmem>>, vector<1x8x1xf32>,
    %c5_44 = arith.constant 5 : index
    %91 = memref.load %arg2[%c5_44] : memref<10xf32, #tpu.memory_space<smem>>
    %92 = vector.broadcast %91 : f32 to vector<8x256xf32>
    %93 = arith.cmpf ogt, %0, %92 : vector<8x256xf32>
    %cst_45 = arith.constant 0.000000e+00 : f32
    %94 = vector.broadcast %cst_45 : f32 to vector<8x256xf32>
    %95 = arith.select %93, %0, %94 : vector<8x256xi1>, vector<8x256xf32>
    %cst_46 = arith.constant dense<0.000000e+00> : vector<8xf32>
    %96 = vector.multi_reduction <add>, %95, %cst_46 [1] : vector<8x256xf32> to vector<8xf32>
    %97 = vector.shape_cast %96 : vector<8xf32> to vector<8x1xf32>
    %c0_47 = arith.constant 0 : index
    %c0_48 = arith.constant 0 : index
    %c6 = arith.constant 6 : index
    %98 = vector.load %arg4[%c0_47, %c0_48, %c6] : memref<1x8x21xf32, #tpu.memory_space<vmem>>, vector<1x8x1xf32>
    %99 = vector.shape_cast %98 : vector<1x8x1xf32> to vector<8x1xf32>
    %100 = vector.shape_cast %97 : vector<8x1xf32> to vector<1x8x1xf32>
    tpu.vector_store %arg4[%c0_47, %c0_48, %c6], %100 {strides = array<i32>} : memref<1x8x21xf32, #tpu.memory_space<vmem>>, vector<1x8x1xf32>,
    %101 = arith.extui %93 : vector<8x256xi1> to vector<8x256xi32>
    %102 = arith.sitofp %101 : vector<8x256xi32> to vector<8x256xf32>
    %cst_49 = arith.constant dense<0.000000e+00> : vector<8xf32>
    %103 = vector.multi_reduction <add>, %102, %cst_49 [1] : vector<8x256xf32> to vector<8xf32>
    %104 = vector.shape_cast %103 : vector<8xf32> to vector<8x1xf32>
    %c0_50 = arith.constant 0 : index
    %c0_51 = arith.constant 0 : index
    %c16 = arith.constant 16 : index
    %105 = vector.load %arg4[%c0_50, %c0_51, %c16] : memref<1x8x21xf32, #tpu.memory_space<vmem>>, vector<1x8x1xf32>
    %106 = vector.shape_cast %105 : vector<1x8x1xf32> to vector<8x1xf32>
    %107 = vector.shape_cast %104 : vector<8x1xf32> to vector<1x8x1xf32>
    tpu.vector_store %arg4[%c0_50, %c0_51, %c16], %107 {strides = array<i32>} : memref<1x8x21xf32, #tpu.memory_space<vmem>>, vector<1x8x1xf32>,
    %c6_52 = arith.constant 6 : index
    %108 = memref.load %arg2[%c6_52] : memref<10xf32, #tpu.memory_space<smem>>
    %109 = vector.broadcast %108 : f32 to vector<8x256xf32>
    %110 = arith.cmpf ogt, %0, %109 : vector<8x256xf32>
    %cst_53 = arith.constant 0.000000e+00 : f32
    %111 = vector.broadcast %cst_53 : f32 to vector<8x256xf32>
    %112 = arith.select %110, %0, %111 : vector<8x256xi1>, vector<8x256xf32>
    %cst_54 = arith.constant dense<0.000000e+00> : vector<8xf32>
    %113 = vector.multi_reduction <add>, %112, %cst_54 [1] : vector<8x256xf32> to vector<8xf32>
    %114 = vector.shape_cast %113 : vector<8xf32> to vector<8x1xf32>
    %c0_55 = arith.constant 0 : index
    %c0_56 = arith.constant 0 : index
    %c7 = arith.constant 7 : index
    %115 = vector.load %arg4[%c0_55, %c0_56, %c7] : memref<1x8x21xf32, #tpu.memory_space<vmem>>, vector<1x8x1xf32>
    %116 = vector.shape_cast %115 : vector<1x8x1xf32> to vector<8x1xf32>
    %117 = vector.shape_cast %114 : vector<8x1xf32> to vector<1x8x1xf32>
    tpu.vector_store %arg4[%c0_55, %c0_56, %c7], %117 {strides = array<i32>} : memref<1x8x21xf32, #tpu.memory_space<vmem>>, vector<1x8x1xf32>,
    %118 = arith.extui %110 : vector<8x256xi1> to vector<8x256xi32>
    %119 = arith.sitofp %118 : vector<8x256xi32> to vector<8x256xf32>
    %cst_57 = arith.constant dense<0.000000e+00> : vector<8xf32>
    %120 = vector.multi_reduction <add>, %119, %cst_57 [1] : vector<8x256xf32> to vector<8xf32>
    %121 = vector.shape_cast %120 : vector<8xf32> to vector<8x1xf32>
    %c0_58 = arith.constant 0 : index
    %c0_59 = arith.constant 0 : index
    %c17 = arith.constant 17 : index
    %122 = vector.load %arg4[%c0_58, %c0_59, %c17] : memref<1x8x21xf32, #tpu.memory_space<vmem>>, vector<1x8x1xf32>
    %123 = vector.shape_cast %122 : vector<1x8x1xf32> to vector<8x1xf32>
    %124 = vector.shape_cast %121 : vector<8x1xf32> to vector<1x8x1xf32>
    tpu.vector_store %arg4[%c0_58, %c0_59, %c17], %124 {strides = array<i32>} : memref<1x8x21xf32, #tpu.memory_space<vmem>>, vector<1x8x1xf32>,
    %c7_60 = arith.constant 7 : index
    %125 = memref.load %arg2[%c7_60] : memref<10xf32, #tpu.memory_space<smem>>
    %126 = vector.broadcast %125 : f32 to vector<8x256xf32>
    %127 = arith.cmpf ogt, %0, %126 : vector<8x256xf32>
    %cst_61 = arith.constant 0.000000e+00 : f32
    %128 = vector.broadcast %cst_61 : f32 to vector<8x256xf32>
    %129 = arith.select %127, %0, %128 : vector<8x256xi1>, vector<8x256xf32>
    %cst_62 = arith.constant dense<0.000000e+00> : vector<8xf32>
    %130 = vector.multi_reduction <add>, %129, %cst_62 [1] : vector<8x256xf32> to vector<8xf32>
    %131 = vector.shape_cast %130 : vector<8xf32> to vector<8x1xf32>
    %c0_63 = arith.constant 0 : index
    %c0_64 = arith.constant 0 : index
    %c8 = arith.constant 8 : index
    %132 = vector.load %arg4[%c0_63, %c0_64, %c8] : memref<1x8x21xf32, #tpu.memory_space<vmem>>, vector<1x8x1xf32>
    %133 = vector.shape_cast %132 : vector<1x8x1xf32> to vector<8x1xf32>
    %134 = vector.shape_cast %131 : vector<8x1xf32> to vector<1x8x1xf32>
    tpu.vector_store %arg4[%c0_63, %c0_64, %c8], %134 {strides = array<i32>} : memref<1x8x21xf32, #tpu.memory_space<vmem>>, vector<1x8x1xf32>,
    %135 = arith.extui %127 : vector<8x256xi1> to vector<8x256xi32>
    %136 = arith.sitofp %135 : vector<8x256xi32> to vector<8x256xf32>
    %cst_65 = arith.constant dense<0.000000e+00> : vector<8xf32>
    %137 = vector.multi_reduction <add>, %136, %cst_65 [1] : vector<8x256xf32> to vector<8xf32>
    %138 = vector.shape_cast %137 : vector<8xf32> to vector<8x1xf32>
    %c0_66 = arith.constant 0 : index
    %c0_67 = arith.constant 0 : index
    %c18 = arith.constant 18 : index
    %139 = vector.load %arg4[%c0_66, %c0_67, %c18] : memref<1x8x21xf32, #tpu.memory_space<vmem>>, vector<1x8x1xf32>
    %140 = vector.shape_cast %139 : vector<1x8x1xf32> to vector<8x1xf32>
    %141 = vector.shape_cast %138 : vector<8x1xf32> to vector<1x8x1xf32>
    tpu.vector_store %arg4[%c0_66, %c0_67, %c18], %141 {strides = array<i32>} : memref<1x8x21xf32, #tpu.memory_space<vmem>>, vector<1x8x1xf32>,
    %c8_68 = arith.constant 8 : index
    %142 = memref.load %arg2[%c8_68] : memref<10xf32, #tpu.memory_space<smem>>
    %143 = vector.broadcast %142 : f32 to vector<8x256xf32>
    %144 = arith.cmpf ogt, %0, %143 : vector<8x256xf32>
    %cst_69 = arith.constant 0.000000e+00 : f32
    %145 = vector.broadcast %cst_69 : f32 to vector<8x256xf32>
    %146 = arith.select %144, %0, %145 : vector<8x256xi1>, vector<8x256xf32>
    %cst_70 = arith.constant dense<0.000000e+00> : vector<8xf32>
    %147 = vector.multi_reduction <add>, %146, %cst_70 [1] : vector<8x256xf32> to vector<8xf32>
    %148 = vector.shape_cast %147 : vector<8xf32> to vector<8x1xf32>
    %c0_71 = arith.constant 0 : index
    %c0_72 = arith.constant 0 : index
    %c9 = arith.constant 9 : index
    %149 = vector.load %arg4[%c0_71, %c0_72, %c9] : memref<1x8x21xf32, #tpu.memory_space<vmem>>, vector<1x8x1xf32>
    %150 = vector.shape_cast %149 : vector<1x8x1xf32> to vector<8x1xf32>
    %151 = vector.shape_cast %148 : vector<8x1xf32> to vector<1x8x1xf32>
    tpu.vector_store %arg4[%c0_71, %c0_72, %c9], %151 {strides = array<i32>} : memref<1x8x21xf32, #tpu.memory_space<vmem>>, vector<1x8x1xf32>,
    %152 = arith.extui %144 : vector<8x256xi1> to vector<8x256xi32>
    %153 = arith.sitofp %152 : vector<8x256xi32> to vector<8x256xf32>
    %cst_73 = arith.constant dense<0.000000e+00> : vector<8xf32>
    %154 = vector.multi_reduction <add>, %153, %cst_73 [1] : vector<8x256xf32> to vector<8xf32>
    %155 = vector.shape_cast %154 : vector<8xf32> to vector<8x1xf32>
    %c0_74 = arith.constant 0 : index
    %c0_75 = arith.constant 0 : index
    %c19 = arith.constant 19 : index
    %156 = vector.load %arg4[%c0_74, %c0_75, %c19] : memref<1x8x21xf32, #tpu.memory_space<vmem>>, vector<1x8x1xf32>
    %157 = vector.shape_cast %156 : vector<1x8x1xf32> to vector<8x1xf32>
    %158 = vector.shape_cast %155 : vector<8x1xf32> to vector<1x8x1xf32>
    tpu.vector_store %arg4[%c0_74, %c0_75, %c19], %158 {strides = array<i32>} : memref<1x8x21xf32, #tpu.memory_space<vmem>>, vector<1x8x1xf32>,
    %c9_76 = arith.constant 9 : index
    %159 = memref.load %arg2[%c9_76] : memref<10xf32, #tpu.memory_space<smem>>
    %160 = vector.broadcast %159 : f32 to vector<8x256xf32>
    %161 = arith.cmpf ogt, %0, %160 : vector<8x256xf32>
    %cst_77 = arith.constant 0.000000e+00 : f32
    %162 = vector.broadcast %cst_77 : f32 to vector<8x256xf32>
    %163 = arith.select %161, %0, %162 : vector<8x256xi1>, vector<8x256xf32>
    %cst_78 = arith.constant dense<0.000000e+00> : vector<8xf32>
    %164 = vector.multi_reduction <add>, %163, %cst_78 [1] : vector<8x256xf32> to vector<8xf32>
    %165 = vector.shape_cast %164 : vector<8xf32> to vector<8x1xf32>
    %c0_79 = arith.constant 0 : index
    %c0_80 = arith.constant 0 : index
    %c10 = arith.constant 10 : index
    %166 = vector.load %arg4[%c0_79, %c0_80, %c10] : memref<1x8x21xf32, #tpu.memory_space<vmem>>, vector<1x8x1xf32>
    %167 = vector.shape_cast %166 : vector<1x8x1xf32> to vector<8x1xf32>
    %168 = vector.shape_cast %165 : vector<8x1xf32> to vector<1x8x1xf32>
    tpu.vector_store %arg4[%c0_79, %c0_80, %c10], %168 {strides = array<i32>} : memref<1x8x21xf32, #tpu.memory_space<vmem>>, vector<1x8x1xf32>,
    %169 = arith.extui %161 : vector<8x256xi1> to vector<8x256xi32>
    %170 = arith.sitofp %169 : vector<8x256xi32> to vector<8x256xf32>
    %cst_81 = arith.constant dense<0.000000e+00> : vector<8xf32>
    %171 = vector.multi_reduction <add>, %170, %cst_81 [1] : vector<8x256xf32> to vector<8xf32>
    %172 = vector.shape_cast %171 : vector<8xf32> to vector<8x1xf32>
    %c0_82 = arith.constant 0 : index
    %c0_83 = arith.constant 0 : index
    %c20 = arith.constant 20 : index
    %173 = vector.load %arg4[%c0_82, %c0_83, %c20] : memref<1x8x21xf32, #tpu.memory_space<vmem>>, vector<1x8x1xf32>
    %174 = vector.shape_cast %173 : vector<1x8x1xf32> to vector<8x1xf32>
    %175 = vector.shape_cast %172 : vector<8x1xf32> to vector<1x8x1xf32>
    tpu.vector_store %arg4[%c0_82, %c0_83, %c20], %175 {strides = array<i32>} : memref<1x8x21xf32, #tpu.memory_space<vmem>>, vector<1x8x1xf32>,
    return
  }
  func.func @transform_0(%arg0: i32, %arg1: i32) -> i32 {
    %c0_i32 = arith.constant 0 : i32
    %c0_i32_0 = arith.constant 0 : i32
    return %c0_i32 : i32
  }
  func.func @transform_1(%arg0: i32, %arg1: i32) -> (i32, i32) {
    %c0_i32 = arith.constant 0 : i32
    return %arg0, %arg1 : i32, i32
  }
  func.func @transform_2(%arg0: i32, %arg1: i32) -> (i32, i32, i32) {
    %c0_i32 = arith.constant 0 : i32
    %c0_i32_0 = arith.constant 0 : i32
    return %arg1, %arg0, %c0_i32 : i32, i32, i32
  }
}

</mosaic_0001>

<bundles_post_ra>
// kernel: tpu_custom_call.1
= control target key start
LH: loop header
LB: loop body
LE: loop exit
PB: predicated region body
PF: predicated region fallthrough
CT: control target
= control target key end

     0   :  { %s1141_s0 = inlined_call_operand.hbm [shape: f32[10], index: 0, kind: input, shape index: {}]   ;;  %s1142_s1 = inlined_call_operand.hbm [shape: f32[16,1024], index: 1, kind: input, shape index: {}]   ;;  %s1143_s2 = inlined_call_operand.hbm [shape: f32[4,16,21], index: 2, kind: output, shape index: {}]  }
   0x1   :  { %1148 = sst [smem:[#allocation15_spill]] %s1141_s0 }
   0x2   :  { %7 = vsyncpa [#allocation5], 0 }
   0x3   :  { %8 = vsyncpa [#allocation3], 0 }
   0x4   :  { %10 = vsyncpa [#allocation3 + $0x1], 0 }
   0x5   :  { %11 = vsyncpa [#allocation4], 0 }
   0x6   :  { %13 = vsyncpa [#allocation4 + $0x1], 0  ;;  %s821_s9 = smov 0   ;;  %s823_s10 = smov 0  }
   0x7   :  { %s825_s11 = smov 0   ;;  %s827_s12 = smov 0  }
   0x8   :  { %s829_s13 = smov 0   ;;  %s831_s14 = smov 0  }
   0x9   :  { %s833_s15 = smov 0   ;;  %s835_s16 = smov 0  }
   0xa LB: > { %1149 = sst [smem:[#allocation11_spill]] %s774_s9  ;;  %s518_s17 = sadd.s32 4294967295, %s802_s16   ;;  %s802_s16 = sphi %s835_s16, %s19_s16   ;;  %s798_s15 = sphi %s833_s15, %s1184_s15   ;;  %s794_s14 = sphi %s831_s14, %s1183_s14   ;;  %s790_s13 = sphi %s829_s13, %s1182_s13   ;;  %s786_s12 = sphi %s827_s12, %s1181_s12   ;;  %s782_s11 = sphi %s825_s11, %s1180_s11   ;;  %s778_s10 = sphi %s823_s10, %s1179_s10   ;;  %s774_s9 = sphi %s821_s9, %s1178_s9  }
   0xb   : > { %s519_s18 = sadd.s32 4294967294, %s802_s16   ;;  %p74_p0 = scmp.ne.s32.totalorder %s778_s10, %s774_s9 }
   0xc   : > { %p865_p1 = scmp.eq.s32.totalorder %s518_s17, 0  ;;  %p106_p2 = scmp.eq.s32.totalorder %s519_s18, 7 }
   0xd   : > { %p520_p4 = scmp.ge.s32.totalorder %s802_s16, 1  ;;  %p113_p6 = scmp.lt.s32.totalorder %s802_s16, 9 }
   0xe   : > { %p871_p3 = por %p865_p1, %p74_p0  ;;  %p876_p5 = por %p106_p2, %p74_p0 }
   0xf   : > { %s1154_s0 = sld [smem:[#allocation15_spill]]  ;;  %p884_p7 = pnand %p520_p4, %p113_p6 }
  0x10   : > { %s1152_s21 = scalar_select %p876_p5, 1, 0 }
  0x11   : > { %p573_p8 = pneg %p884_p7  ;;  %s28_s26 = sadd.s32 1, %s794_s14 }
  0x12   : > { %1153 = sst [smem:[#allocation12_spill]] %s1152_s21  ;;  %s804_s27 = smov [#allocation2]  }
  0x13   : > { %p574_p9 = pnand %p573_p8, %p865_p1  ;;  %p29_p10 = scmp.ge.s32.totalorder %s28_s26, 4 }
  0x14   : > { %s31_s28 = sadd.s32 1, %s798_s15  ;;  %p100_p11 = scmp.eq.s32.totalorder %s518_s17, 7 }
  0x15   : > { %s125_s24 = sshll.u32 %s1154_s0, 4  ;;  %p68_p12 = scmp.ne.s32.totalorder %s782_s11, %s778_s10  ;;  %s126_s24 = int_to_ptr.hbm [resolvable:$true] %s125_s24 }
  0x16   : > { %576 = dma.hbm_to_smem (!%p574_p9), %s126_s24, 16, %s804_s27, [#allocation5]  }
  0x17   : > { %s1186_s26 = smov (%p29_p10, %s28_s26), 0  ;;  %s1188_s28 = smov (!%p29_p10, %s31_s28), %s798_s15 }
  0x18   : > { %1156 = sst [smem:[#allocation13_spill]] %s1186_s26  ;;  %s61_s29 = sadd.s32 1, %s782_s11 }
  0x19   : > { %p69_p13 = scmp.eq.s32.totalorder %s802_s16, 0  ;;  %p33_p0 = scmp.ge.s32.totalorder %s1188_s28, 2 }
  0x1a   : > { %p901_p2 = por %p100_p11, %p68_p12  ;;  %s57_s3 = ssub.s32 %s794_s14, %s1186_s26 }
  0x1b   : > { %p907_p4 = por %p69_p13, %p68_p12  ;;  %s1190_s28 = smov (%p33_p0, %s1188_s28), 0 }
  0x1c   : > { %1159 = sst [smem:[#allocation14_spill]] %s1190_s28  ;;  %p586_p6 = scmp.lt.s32.totalorder %s802_s16, 8 }
  0x1d   : > { %s136_s5 = sand.u32 1, %s782_s11   ;;  %s56_s6 = ssub.s32 %s798_s15, %s1190_s28 }
  0x1e   : > { %s524_s7 = sshll.u32 %s794_s14, 1  ;;  %s58_s8 = sor.u32 %s57_s3, %s56_s6 }
  0x1f   : > { %s523_s17 = sshll.u32 %s136_s5, 4  ;;  %p59_p8 = scmp.eq.s32.totalorder %s58_s8, 0 }
  0x20   : > { %s525_s18 = sshll.u32 %s798_s15, 3  ;;  %s140_s22 = scalar_lea.vmem [#allocation6], %s523_s17 }
  0x21   : > { %s151_s23 = sshll.u32 %s140_s22, 4  ;;  %s145_s27 = sadd.s32 %s525_s18, %s524_s7  ;;  %s152_s23 = int_to_ptr.vmem [resolvable:$true] %s151_s23 }
  0x22   : > { %s920_s24 = scalar_select %p59_p8, %s782_s11, %s61_s29  }
  0x23   : > { %s526_s0 = sshll.u32 %s145_s27, 3  ;;  %p578_p9 = pnand %p586_p6, %p907_p4 }
  0x24   : > { %s147_s9 = scalar_lea.hbm %s1142_s1, %s526_s0  ;;  %s137_s3 = scalar_lea.sflag [#allocation3], %s136_s5 }
  0x25   : > { %s149_s28 = sshll.u32 %s147_s9, 4  ;;  %160 = sbr.rel (%p884_p7) target bundleno = 229 (0xe5), region = 28  ;;  %s150_s28 = int_to_ptr.hbm [resolvable:$true] %s149_s28 }
  0x26   : > { %580 = dma.hbm_to_vmem [thread:$0]  (!%p578_p9), %s150_s28, 256, %s152_s23, %s137_s3  }
  0x2a   : > { %761 = dma.done.wait (%p865_p1), [#allocation5], 16  }
  0x2b   : > { %763 = vsyncadd (%p865_p1), [#allocation5], 4294967280  ;;  %s936_s29 = sand.u32 1, %s778_s10  }
  0x2c   : > { %s529_s0 = sshll.u32 %s936_s29, 4  ;;  %s168_s9 = scalar_lea.sflag [#allocation3], %s936_s29 }
  0x2d   : > { %s171_s21 = scalar_lea.vmem [#allocation6], %s529_s0 }
  0x2e   : > { %765 = dma.done.wait (%p871_p3), %s168_s9, 256  }
  0x2f   : > { %767 = vsyncadd (%p871_p3), %s168_s9, 4294967040 }
  0x30   : > { %177 = sfence }
  0x31   : > { %v944_v0 = vld [vmem:[%s171_s21] sm:$0xff]  ;;  %v946_v1 = vld [vmem:[%s171_s21 + $0x8] sm:$0xff]  ;;  %s202_s19 = sld [smem:[#allocation2]]  ;;  %v805_v5 = vmov 0.0   ;;  %s530_s17 = sshll.u32 %s936_s29, 3 }
  0x32   : > { %v197_v2 = vadd.f32 %v946_v1, %v944_v0  ;;  %s533_s25 = sld [smem:[#allocation2 + $0x1]]  ;;  %s1073_s18 = scalar_lea.vmem [#allocation7], %s530_s17 }
  0x33   : > { %s536_s26 = sld [smem:[#allocation2 + $0x2]]  ;;  %s561_s22 = sshll.u32 %s786_s12, 1 }
  0x34   : > { %198 = vadd.xlane.f32.xlu0 %v197_v2  ;;  %s950_s28 = sld [smem:[#allocation2 + $0x3]]  ;;  %s413_s23 = sadd.s32 %s790_s13, %s561_s22 }
  0x35   : > { %s954_s20 = sld [smem:[#allocation2 + $0x4]]  ;;  %s562_s27 = sshll.u32 %s413_s23, 3 }
  0x36   : > { %s545_s4 = sld [smem:[#allocation2 + $0x5]]  ;;  %s415_s12 = scalar_lea.hbm %s1143_s2, %s562_s27 }
  0x37   : > { %v203_v3 = vstv %s202_s19  ;;  %s548_s5 = sld [smem:[#allocation2 + $0x6]]  ;;  %s417_s13 = sshll.u32 %s1073_s18, 4  ;;  %s418_s13 = int_to_ptr.vmem [resolvable:$true] %s417_s13 }
  0x38   : > { %vm204_vm0 = vcmp.gt.f32.partialorder %v944_v0, %v203_v3  ;;  %vm205_vm1 = vcmp.gt.f32.partialorder %v946_v1, %v203_v3  ;;  %v223_v4 = vstv %s533_s25  ;;  %s551_s6 = sld [smem:[#allocation2 + $0x7]]  ;;  %s419_s9 = sshll.u32 %s415_s12, 4  ;;  %s420_s9 = int_to_ptr.hbm [resolvable:$true] %s419_s9 }
  0x39   : > { %v531_v6 = vsel %vm204_vm0, 1.0, %v805_v5  ;;  %v532_v7 = vsel %vm205_vm1, 1.0, %v805_v5  ;;  %v206_v8 = vsel %vm204_vm0, %v944_v0, 0.0  ;;  %v207_v9 = vsel %vm205_vm1, %v946_v1, 0.0  ;;  %s554_s7 = sld [smem:[#allocation2 + $0x8]]  ;;  %s403_s21 = scalar_lea.sflag [#allocation4], %s936_s29 }
  0x3a   : > { %v217_v10 = vadd.f32 %v532_v7, %v531_v6  ;;  %v208_v11 = vadd.f32 %v207_v9, %v206_v8  ;;  %vm961_vm2 = vcmp.gt.f32.partialorder %v944_v0, %v223_v4  ;;  %vm966_vm3 = vcmp.gt.f32.partialorder %v946_v1, %v223_v4  ;;  %s557_s8 = sld [smem:[#allocation2 + $0x9]]  ;;  %s714_s19 = sshra.s32 %s420_s9, 4  ;;  %s715_s19 = int_to_ptr.hbm [resolvable:$true] %s714_s19 }
  0x3b   : > { %v534_v14 = vsel %vm961_vm2, 1.0, %v805_v5  ;;  %v535_v15 = vsel %vm966_vm3, 1.0, %v805_v5  ;;  %v243_v17 = vstv %s536_s26  ;;  %v226_v18 = vsel %vm961_vm2, %v944_v0, 0.0  ;;  %s716_s25 = scalar_lea.hbm %s715_s19, 8  ;;  %p721_p10 = scmp.lt.s32.totalorder %s715_s19, %s1143_s2 }
  0x3c   : > { %218 = vadd.xlane.f32.xlu1 %v217_v10  ;;  %209 = vadd.xlane.f32.xlu0 %v208_v11  ;;  %v237_v16 = vadd.f32 %v535_v15, %v534_v14  ;;  %v227_v19 = vsel %vm966_vm3, %v946_v1, 0.0  ;;  %vm244_vm4 = vcmp.gt.f32.partialorder %v944_v0, %v243_v17  ;;  %vm245_vm5 = vcmp.gt.f32.partialorder %v946_v1, %v243_v17  ;;  %p717_p1 = scmp.ne.s32.totalorder %s715_s19, %s716_s25 }
  0x3d   : > { %v537_v20 = vsel %vm244_vm4, 1.0, %v805_v5  ;;  %v538_v21 = vsel %vm245_vm5, 1.0, %v805_v5  ;;  %v263_v22 = vstv %s950_s28  ;;  %v246_v23 = vsel %vm244_vm4, %v944_v0, 0.0 }
  0x3e   : > { %238 = vadd.xlane.f32.xlu2 %v237_v16  ;;  %v247_v24 = vsel %vm245_vm5, %v946_v1, 0.0  ;;  %v228_v25 = vadd.f32 %v227_v19, %v226_v18  ;;  %v257_v26 = vadd.f32 %v538_v21, %v537_v20  ;;  %v283_v27 = vstv %s954_s20  ;;  %p718_p3 = pnand %p717_p1, %p901_p2  ;;  %s720_s20 = scalar_lea.hbm %s1143_s2, 64 }
  0x3f   : > { %vm991_vm6 = vcmp.gt.f32.partialorder %v944_v0, %v263_v22  ;;  %v248_v29 = vadd.f32 %v247_v24, %v246_v23  ;;  %vm265_vm7 = vcmp.gt.f32.partialorder %v946_v1, %v263_v22  ;;  %vm997_vm8 = vcmp.gt.f32.partialorder %v944_v0, %v283_v27  ;;  %p722_p11 = scmp.lt.s32.totalorder %s720_s20, %s716_s25 }
  0x40   : > { %vm1002_vm9 = vcmp.gt.f32.partialorder %v946_v1, %v283_v27  ;;  %v266_v32 = vsel %vm991_vm6, %v944_v0, 0.0  ;;  %v267_v33 = vsel %vm265_vm7, %v946_v1, 0.0  ;;  %v286_v34 = vsel %vm997_vm8, %v944_v0, 0.0  ;;  %p719_p7 = pneg %p718_p3 }
  0x41   : > { %v287_v35 = vsel %vm1002_vm9, %v946_v1, 0.0  ;;  %v540_v36 = vsel %vm991_vm6, 1.0, %v805_v5  ;;  %v541_v37 = vsel %vm265_vm7, 1.0, %v805_v5  ;;  %v268_v38 = vadd.f32 %v267_v33, %v266_v32  ;;  %p723_p12 = por %p722_p11, %p721_p10 }
  0x42   : > { %v288_v39 = vadd.f32 %v287_v35, %v286_v34  ;;  %v303_v40 = vstv %s545_s4  ;;  %v277_v41 = vadd.f32 %v541_v37, %v540_v36  ;;  %v543_v42 = vsel %vm997_vm8, 1.0, %v805_v5 }
  0x43   : > { %vm304_vm10 = vcmp.gt.f32.partialorder %v944_v0, %v303_v40  ;;  %vm305_vm11 = vcmp.gt.f32.partialorder %v946_v1, %v303_v40  ;;  %v544_v43 = vsel %vm1002_vm9, 1.0, %v805_v5  ;;  %v323_v48 = vstv %s548_s5  ;;  %p724_p13 = pnand %p723_p12, %p719_p7 }
  0x44   : > { %229 = vadd.xlane.f32.xlu1 %v228_v25  ;;  %258 = vadd.xlane.f32.xlu0 %v257_v26  ;;  %v546_v44 = vsel %vm304_vm10, 1.0, %v805_v5  ;;  %v547_v45 = vsel %vm305_vm11, 1.0, %v805_v5  ;;  %v306_v46 = vsel %vm304_vm10, %v944_v0, 0.0  ;;  %v307_v47 = vsel %vm305_vm11, %v946_v1, 0.0 }
  0x45   : > { %v343_v49 = vstv %s551_s6  ;;  %v297_v50 = vadd.f32 %v544_v43, %v543_v42  ;;  %v317_v51 = vadd.f32 %v547_v45, %v546_v44  ;;  %v308_v52 = vadd.f32 %v307_v47, %v306_v46 }
  0x46   : > { %249 = vadd.xlane.f32.xlu2 %v248_v29  ;;  %vm324_vm12 = vcmp.gt.f32.partialorder %v944_v0, %v323_v48  ;;  %vm325_vm13 = vcmp.gt.f32.partialorder %v946_v1, %v323_v48  ;;  %vm1035_vm14 = vcmp.gt.f32.partialorder %v944_v0, %v343_v49  ;;  %vm1040_vm15 = vcmp.gt.f32.partialorder %v946_v1, %v343_v49 }
  0x47   : > { %v326_v55 = vsel %vm324_vm12, %v944_v0, 0.0  ;;  %v327_v56 = vsel %vm325_vm13, %v946_v1, 0.0  ;;  %v346_v57 = vsel %vm1035_vm14, %v944_v0, 0.0  ;;  %v347_v58 = vsel %vm1040_vm15, %v946_v1, 0.0 }
  0x48   : > { %v549_v59 = vsel %vm324_vm12, 1.0, %v805_v5  ;;  %v550_v60 = vsel %vm325_vm13, 1.0, %v805_v5  ;;  %v328_v61 = vadd.f32 %v327_v56, %v326_v55  ;;  %v348_v62 = vadd.f32 %v347_v58, %v346_v57 }
  0x49   : > { %v363_v63 = vstv %s554_s7  ;;  %v337_v2 = vadd.f32 %v550_v60, %v549_v59  ;;  %v552_v3 = vsel %vm1035_vm14, 1.0, %v805_v5  ;;  %v553_v4 = vsel %vm1040_vm15, 1.0, %v805_v5 }
  0x4a   : > { %vm364_vm0 = vcmp.gt.f32.partialorder %v944_v0, %v363_v63  ;;  %vm365_vm1 = vcmp.gt.f32.partialorder %v946_v1, %v363_v63  ;;  %v383_v10 = vstv %s557_s8  ;;  %v357_v11 = vadd.f32 %v553_v4, %v552_v3 }
  0x4b   : > { %v555_v6 = vsel %vm364_vm0, 1.0, %v805_v5  ;;  %v556_v7 = vsel %vm365_vm1, 1.0, %v805_v5  ;;  %v366_v8 = vsel %vm364_vm0, %v944_v0, 0.0  ;;  %v367_v9 = vsel %vm365_vm1, %v946_v1, 0.0 }
  0x4c   : > { %269 = vadd.xlane.f32.xlu1 %v268_v38  ;;  %289 = vadd.xlane.f32.xlu0 %v288_v39  ;;  %v377_v12 = vadd.f32 %v556_v7, %v555_v6  ;;  %v368_v13 = vadd.f32 %v367_v9, %v366_v8  ;;  %vm384_vm2 = vcmp.gt.f32.partialorder %v944_v0, %v383_v10  ;;  %vm200_vm4 = vcmask 7168  }
  0x4d   : > { %vm385_vm3 = vcmp.gt.f32.partialorder %v946_v1, %v383_v10  ;;  %v386_v14 = vsel %vm384_vm2, %v944_v0, 0.0  ;;  %v558_v16 = vsel %vm384_vm2, 1.0, %v805_v5  ;;  %vm211_vm5 = vcmask 15368  }
  0x4e   : > { %278 = vadd.xlane.f32.xlu2 %v277_v41  ;;  %v387_v15 = vsel %vm385_vm3, %v946_v1, 0.0  ;;  %v559_v17 = vsel %vm385_vm3, 1.0, %v805_v5  ;;  %vm220_vm6 = vcmask 97368   ;;  %vm231_vm7 = vcmask 23568  }
  0x4f   : > { %v388_v18 = vadd.f32 %v387_v15, %v386_v14  ;;  %v397_v19 = vadd.f32 %v559_v17, %v558_v16  ;;  %vm240_vm8 = vcmask 105568   ;;  %vm251_vm9 = vcmask 31768  }
  0x50   : > { %vm260_vm10 = vcmask 113768   ;;  %vm271_vm11 = vcmask 39968   ;;  %vm280_vm12 = vcmask 121968   ;;  %vm291_vm13 = vcmask 48168  }
  0x51   : > { %vm300_vm14 = vcmask 130168   ;;  %vm311_vm15 = vcmask 56368   ;;  %vm320_vm0 = vcmask 138368   ;;  %vm331_vm1 = vcmask 64568  }
  0x52   : > { %vm340_vm2 = vcmask 146568   ;;  %vm351_vm3 = vcmask 72768  }
  0x54   : > { %298 = vadd.xlane.f32.xlu1 %v297_v50  ;;  %318 = vadd.xlane.f32.xlu0 %v317_v51 }
  0x56   : > { %309 = vadd.xlane.f32.xlu2 %v308_v52 }
  0x5c   : > { %329 = vadd.xlane.f32.xlu1 %v328_v61  ;;  %349 = vadd.xlane.f32.xlu0 %v348_v62 }
  0x5e   : > { %338 = vadd.xlane.f32.xlu2 %v337_v2 }
  0x64   : > { %358 = vadd.xlane.f32.xlu1 %v357_v11  ;;  %378 = vadd.xlane.f32.xlu0 %v377_v12 }
  0x66   : > { %369 = vadd.xlane.f32.xlu2 %v368_v13 }
  0x6c   : > { %389 = vadd.xlane.f32.xlu1 %v388_v18 }
  0x6e   : > { %398 = vadd.xlane.f32.xlu2 %v397_v19 }
  0xa7   : > { %v199_v20 = vpop.xlane.xlu0 %198 }
  0xa8   : > { %201 = vst.msk [vmem:[%s1073_s18] sm:$0xff] %vm200_vm4, %v199_v20  ;;  %vm360_vm4 = vcmask 154768  }
  0xaf   : > { %v219_v0 = vpop.xlane.xlu1 %218  ;;  %v210_v1 = vpop.xlane.xlu0 %209 }
  0xb0   : > { %212 = vst.msk [vmem:[%s1073_s18] sm:$0xff] %vm211_vm5, %v210_v1  ;;  %vm371_vm5 = vcmask 80968  }
  0xb1   : > { %v239_v5 = vpop.xlane.xlu2 %238  ;;  %221 = vst.msk [vmem:[%s1073_s18] sm:$0xff] %vm220_vm6, %v219_v0  ;;  %vm380_vm6 = vcmask 162968  }
  0xb7   : > { %v230_v21 = vpop.xlane.xlu1 %229  ;;  %v259_v22 = vpop.xlane.xlu0 %258 }
  0xb8   : > { %232 = vst.msk [vmem:[%s1073_s18] sm:$0xff] %vm231_vm7, %v230_v21  ;;  %vm391_vm7 = vcmask 89168  }
  0xb9   : > { %v250_v23 = vpop.xlane.xlu2 %249  ;;  %241 = vst.msk [vmem:[%s1073_s18] sm:$0xff] %vm240_vm8, %v239_v5  ;;  %vm400_vm8 = vcmask 171168  }
  0xba   : > { %252 = vst.msk [vmem:[%s1073_s18] sm:$0xff] %vm251_vm9, %v250_v23 }
  0xbb   : > { %261 = vst.msk [vmem:[%s1073_s18] sm:$0xff] %vm260_vm10, %v259_v22 }
  0xbf   : > { %v270_v24 = vpop.xlane.xlu1 %269  ;;  %v290_v25 = vpop.xlane.xlu0 %289 }
  0xc0   : > { %272 = vst.msk [vmem:[%s1073_s18] sm:$0xff] %vm271_vm11, %v270_v24 }
  0xc1   : > { %v279_v26 = vpop.xlane.xlu2 %278 }
  0xc2   : > { %281 = vst.msk [vmem:[%s1073_s18] sm:$0xff] %vm280_vm12, %v279_v26 }
  0xc3   : > { %292 = vst.msk [vmem:[%s1073_s18] sm:$0xff] %vm291_vm13, %v290_v25 }
  0xc7   : > { %v299_v27 = vpop.xlane.xlu1 %298  ;;  %v319_v28 = vpop.xlane.xlu0 %318 }
  0xc8   : > { %301 = vst.msk [vmem:[%s1073_s18] sm:$0xff] %vm300_vm14, %v299_v27 }
  0xc9   : > { %v310_v29 = vpop.xlane.xlu2 %309 }
  0xca   : > { %312 = vst.msk [vmem:[%s1073_s18] sm:$0xff] %vm311_vm15, %v310_v29 }
  0xcb   : > { %321 = vst.msk [vmem:[%s1073_s18] sm:$0xff] %vm320_vm0, %v319_v28 }
  0xcf   : > { %v330_v30 = vpop.xlane.xlu1 %329  ;;  %v350_v31 = vpop.xlane.xlu0 %349 }
  0xd0   : > { %332 = vst.msk [vmem:[%s1073_s18] sm:$0xff] %vm331_vm1, %v330_v30 }
  0xd1   : > { %v339_v32 = vpop.xlane.xlu2 %338 }
  0xd2   : > { %341 = vst.msk [vmem:[%s1073_s18] sm:$0xff] %vm340_vm2, %v339_v32 }
  0xd3   : > { %352 = vst.msk [vmem:[%s1073_s18] sm:$0xff] %vm351_vm3, %v350_v31 }
  0xd7   : > { %v359_v33 = vpop.xlane.xlu1 %358  ;;  %v379_v34 = vpop.xlane.xlu0 %378 }
  0xd8   : > { %361 = vst.msk [vmem:[%s1073_s18] sm:$0xff] %vm360_vm4, %v359_v33 }
  0xd9   : > { %v370_v35 = vpop.xlane.xlu2 %369 }
  0xda   : > { %372 = vst.msk [vmem:[%s1073_s18] sm:$0xff] %vm371_vm5, %v370_v35 }
  0xdb   : > { %381 = vst.msk [vmem:[%s1073_s18] sm:$0xff] %vm380_vm6, %v379_v34 }
  0xdf   : > { %v390_v36 = vpop.xlane.xlu1 %389 }
  0xe0   : > { %392 = vst.msk [vmem:[%s1073_s18] sm:$0xff] %vm391_vm7, %v390_v36 }
  0xe1   : > { %v399_v37 = vpop.xlane.xlu2 %398 }
  0xe2   : > { %401 = vst.msk [vmem:[%s1073_s18] sm:$0xff] %vm400_vm8, %v399_v37 }
  0xe3   : > { %727 = shalt.err (!%p724_p13)
}
  0xe4   : > { %571 = dma.vmem_to_hbm [thread:$0]  (%p901_p2), %s418_s13, 128, %s420_s9, %s403_s21  }
  0xe5 PF: > { %s1174_s29 = sld [smem:[#allocation11_spill]]  ;;  %p588_p0 = scmp.ge.s32.totalorder %s802_s16, 2 }
  0xe7   : > { %p582_p4 = pnand %p588_p0, %p876_p5 }
  0xe9   : > { %p583_p6 = pneg %p582_p4 }
  0xeb   : > { %s431_s7 = sand.u32 1, %s1174_s29  }
  0xec   : > { %s432_s8 = scalar_lea.sflag [#allocation4], %s431_s7 }
  0xed   : > { %769 = dma.done.wait (%p583_p6), %s432_s8, 128  }
  0xee   : > { %771 = vsyncadd (%p583_p6), %s432_s8, 4294967168  ;;  %s19_s16 = sadd.s32 1, %s802_s16   ;;  %s1176_s30 = sld [smem:[#allocation13_spill]] }
  0xef   : > { %p16_p8 = scmp.ge.s32.totalorder %s19_s16, 10   ;;  %s1177_s17 = sld [smem:[#allocation14_spill]] }
  0xf0   : > { %s1178_s9 = smov %s778_s10  ;;  %s1179_s10 = smov %s782_s11 }
  0xf1   : > { %s1180_s11 = smov %s920_s24  ;;  %s1181_s12 = smov %s794_s14 }
  0xf2   : > { %s1182_s13 = smov %s798_s15  ;;  %18 = sbr.rel (!%p16_p8) target bundleno = 10 (0xa), region = 78 }
  0xf4   : > { %s1183_s14 = smov %s1176_s30 }
  0xf5   : > { %s1184_s15 = smov %s1177_s17 }
  0xf7   :  { %438 = vsyncpa [#allocation3], 1 }
  0xf8   :  { %440 = vsyncpa [#allocation3 + $0x1], 1 }
  0xf9   :  { %441 = vsyncpa [#allocation4], 1 }
  0xfa   :  { %443 = vsyncpa [#allocation4 + $0x1], 1 }
  0xfb   :  { %444 = vsyncpa [#allocation5], 1 }
  0xfc   :  { %446 = vsyncpa [#allocation5 + $0x1], 1 }

</bundles_post_ra>
